<compile_context>
chip_gen: v7x
topology: tpu7x:2x2x1
jax: 0.10.0
libtpu: 0.0.40
codegen_flags: <defaults>
</compile_context>

<pallas_src>
import jax
import jax.numpy as jnp
from jax.experimental import pallas as pl
from jax.experimental.pallas import tpu as pltpu

LANES = 128                      # vreg lane width: last dim must be lane-dense
TILE_M_MAX = 8192                # (8192, 128) f32 = 4 MiB per block
SMALL_N = LANES * 8              # below this, fused XLA beats pad+launch+slice
VMEM_LIMIT_BYTES = 32 * 1024 * 1024   # 16 MiB double-buffered in+out, headroom


def _linear_kernel(x_ref, wb_ref, o_ref):
    # x_ref  : (tile_m, 128) tile of the lane-dense input slab (VMEM)
    # wb_ref : (2,) f32 in SMEM -> wb_ref[0] = weight, wb_ref[1] = bias
    # o_ref  : (tile_m, 128) output tile (VMEM)
    w = wb_ref[0]
    b = wb_ref[1]
    # Pure VPU multiply-add in f32; cast back to the output dtype in-kernel.
    y = x_ref[...].astype(jnp.float32) * w + b
    o_ref[...] = y.astype(o_ref.dtype)


def _round_up(v, m):
    return ((v + m - 1) // m) * m


def _pick_tile_m(m_rows):
    # Keep at least 2 grid steps so dimension_semantics=("parallel",) can
    # shard the batch axis across v7x's two TensorCores; keep the tile a
    # multiple of 8 sublanes; cap at 4 MiB per block.
    half = _round_up(pl.cdiv(m_rows, 2), 8)
    return max(8, min(TILE_M_MAX, half))


def linear_model_forward(x, weight, bias):
    """Forward pass of LinearModel: y = x @ weight^T + bias.

    x      : (N, 1) float32
    weight : (1, 1) float32   (torch.nn.Linear(1, 1).weight)
    bias   : (1,)   float32   (torch.nn.Linear(1, 1).bias)
    returns: (N, 1) float32
    """
    n, in_f = x.shape
    assert in_f == 1 and weight.shape == (1, 1) and bias.shape == (1,)

    # Tiny inputs: pad + kernel launch + slice cost more than fused XLA.
    if n < SMALL_N:
        return (x @ weight.T + bias).astype(x.dtype)

    # ---- lane-dense layout: (N, 1) -> (m_rows, 128); pad only to 128 ------
    m_rows = pl.cdiv(n, LANES)
    n_padded = m_rows * LANES
    x_flat = x.reshape(-1)
    if n_padded != n:
        x_flat = jnp.pad(x_flat, (0, n_padded - n))
    x_slab = x_flat.reshape(m_rows, LANES)

    # Scalar params packed into a tiny f32 SMEM array: [w, b]
    wb = jnp.concatenate(
        [weight.reshape(-1), bias.reshape(-1)]).astype(jnp.float32)

    tile_m = _pick_tile_m(m_rows)
    grid = (pl.cdiv(m_rows, tile_m),)   # ragged last block handled by Pallas

    out_slab = pl.pallas_call(
        _linear_kernel,
        out_shape=jax.ShapeDtypeStruct((m_rows, LANES), x.dtype),
        grid_spec=pltpu.PrefetchScalarGridSpec(
            num_scalar_prefetch=0,
            grid=grid,
            in_specs=[
                # large lane-dense input tiles streamed over the batch axis
                pl.BlockSpec((tile_m, LANES), lambda i: (i, 0)),
                # scalar weight/bias on the scalar (SMEM) path, not VMEM
                pl.BlockSpec(memory_space=pltpu.MemorySpace.SMEM),
            ],
            out_specs=pl.BlockSpec((tile_m, LANES), lambda i: (i, 0)),
        ),
        compiler_params=pltpu.CompilerParams(
            # batch axis is independent -> shardable across v7x's two TCs
            dimension_semantics=("parallel",),
            vmem_limit_bytes=VMEM_LIMIT_BYTES,
            # let the pad/reshape producer fuse into the input DMA
            allow_input_fusion=[True, False],
        ),
        cost_estimate=pl.CostEstimate(
            flops=2 * n_padded,
            transcendentals=0,
            bytes_accessed=2 * n_padded * x.dtype.itemsize,
        ),
    )(x_slab, wb)

    # ---- restore the (N, 1) shape; skip the slice copy when 128-aligned ---
    if n_padded == n:
        return out_slab.reshape(n, 1)
    return out_slab.reshape(-1)[:n].reshape(n, 1)


if __name__ == "__main__":
    key = jax.random.PRNGKey(0)
    kx, kw, kb = jax.random.split(key, 3)

    # Deterministic parameters (Linear(1, 1) parameter shapes)
    weight = jax.random.uniform(kw, (1, 1), dtype=jnp.float32,
                                minval=-1.0, maxval=1.0)
    bias = jax.random.uniform(kb, (1,), dtype=jnp.float32,
                              minval=-1.0, maxval=1.0)

    fwd = jax.jit(linear_model_forward)

    # 4096: 128-aligned (no pad / no slice, 2 grid steps)
    # 4296: ragged (pad to 128, ragged last block, slice-back path)
    #  200: tiny -> plain-XLA short-circuit
    for n in (4096, 4296, 200):
        x = jax.random.normal(jax.random.fold_in(kx, n), (n, 1),
                              dtype=jnp.float32)
        y = jax.block_until_ready(fwd(x, weight, bias))
        y_ref = x @ weight.T + bias
        assert y.shape == (n, 1)
        assert jnp.allclose(y, y_ref, atol=1e-6), f"mismatch vs ref, N={n}"

    print("KERNEL_OK")
</pallas_src>

<mosaic_0001>
module attributes {stable_mosaic.version = 11 : i64} {
  func.func @_linear_kernel(%arg0: i32, %arg1: memref<16x128xf32, #tpu.memory_space<vmem>>, %arg2: memref<2xf32, #tpu.memory_space<smem>>, %arg3: memref<16x128xf32, #tpu.memory_space<vmem>>) attributes {dimension_semantics = [#tpu.dimension_semantics<parallel>], iteration_bounds = array<i64: 2>, scalar_prefetch = 0 : i64, scratch_operands = 0 : i64, tpu.core_type = #tpu.core_type<tc>, window_params = [{transform_indices = @transform_0, window_bounds = array<i64: 16, 128>}, {transform_indices = @transform_1, window_bounds = array<i64: 2>}, {transform_indices = @transform_2, window_bounds = array<i64: 16, 128>}]} {
    %c0 = arith.constant 0 : index
    %0 = memref.load %arg2[%c0] : memref<2xf32, #tpu.memory_space<smem>>
    %c1 = arith.constant 1 : index
    %1 = memref.load %arg2[%c1] : memref<2xf32, #tpu.memory_space<smem>>
    %c0_0 = arith.constant 0 : index
    %c0_1 = arith.constant 0 : index
    %2 = vector.load %arg1[%c0_0, %c0_1] : memref<16x128xf32, #tpu.memory_space<vmem>>, vector<16x128xf32>
    %3 = vector.broadcast %0 : f32 to vector<16x128xf32>
    %4 = arith.mulf %2, %3 : vector<16x128xf32>
    %5 = vector.broadcast %1 : f32 to vector<16x128xf32>
    %6 = arith.addf %4, %5 : vector<16x128xf32>
    %c0_2 = arith.constant 0 : index
    %c0_3 = arith.constant 0 : index
    %7 = vector.load %arg3[%c0_2, %c0_3] : memref<16x128xf32, #tpu.memory_space<vmem>>, vector<16x128xf32>
    tpu.vector_store %arg3[%c0_2, %c0_3], %6 {strides = array<i32>} : memref<16x128xf32, #tpu.memory_space<vmem>>, vector<16x128xf32>,
    return
  }
  func.func @transform_0(%arg0: i32) -> (i32, i32) {
    %c0_i32 = arith.constant 0 : i32
    %c0_i32_0 = arith.constant 0 : i32
    return %arg0, %c0_i32 : i32, i32
  }
  func.func @transform_1(%arg0: i32) -> i32 {
    %c0_i32 = arith.constant 0 : i32
    %c0_i32_0 = arith.constant 0 : i32
    return %c0_i32 : i32
  }
  func.func @transform_2(%arg0: i32) -> (i32, i32) {
    %c0_i32 = arith.constant 0 : i32
    %c0_i32_0 = arith.constant 0 : i32
    return %arg0, %c0_i32 : i32, i32
  }
}

</mosaic_0001>

<bundles_post_ra>
// kernel: linear_model_forward.1
= control target key start
LH: loop header
LB: loop body
LE: loop exit
PB: predicated region body
PF: predicated region fallthrough
CT: control target
= control target key end

     0   :  { %7 = vsyncpa [#allocation3], 0  ;;  %s697_s0 = inlined_call_operand.hbm [shape: f32[32,128], index: 0, kind: input, shape index: {}]   ;;  %s698_s1 = inlined_call_operand.vmem [shape: f32[2], index: 1, kind: input, shape index: {}]   ;;  %s699_s2 = inlined_call_operand.hbm [shape: f32[32,128], index: 2, kind: output, shape index: {}]  }
   0x1   :  { %9 = vsyncpa [#allocation3 + $0x1], 0 }
   0x2   :  { %10 = vsyncpa [#allocation5], 0 }
   0x3   :  { %11 = vsyncpa [#allocation4], 0 }
   0x4   :  { %13 = vsyncpa [#allocation4 + $0x1], 0  ;;  %s508_s9 = smov 0   ;;  %s510_s10 = smov 0  }
   0x5   :  { %s512_s11 = smov 0   ;;  %s514_s12 = smov 0  }
   0x6 LB: > { %s529_s13 = sadd.s32 4294967295, %s484_s12   ;;  %s289_s14 = sadd.s32 4294967294, %s484_s12   ;;  %s484_s12 = sphi %s514_s12, %s719_s12   ;;  %s480_s11 = sphi %s512_s11, %s718_s11   ;;  %s476_s10 = sphi %s510_s10, %s717_s10   ;;  %s472_s9 = sphi %s508_s9, %s716_s9  }
   0x7   : > { %s533_s15 = sadd.s32 1, %s484_s12   ;;  %s26_s16 = sadd.s32 1, %s480_s11 }
   0x8   : > { %s23_s17 = ssub.s32 %s484_s12, %s533_s15  ;;  %p33_p0 = scmp.ne.s32.totalorder %s480_s11, %s476_s10 }
   0x9   : > { %p24_p1 = scmp.eq.s32.totalorder %s23_s17, 0  ;;  %p34_p2 = scmp.eq.s32.totalorder %s484_s12, 0 }
   0xa   : > { %p39_p3 = scmp.ne.s32.totalorder %s476_s10, %s472_s9  ;;  %p701_p4 = scmp.eq.s32.totalorder %s529_s13, 0 }
   0xb   : > { %s545_s18 = scalar_select %p24_p1, %s480_s11, %s26_s16  }
   0xc   : > { %p547_p5 = por %p34_p2, %p33_p0  ;;  %p553_p6 = por %p701_p4, %p39_p3 }
   0xd   : > { %p84_p7 = scmp.eq.s32.totalorder %s529_s13, 1  ;;  %p90_p8 = scmp.eq.s32.totalorder %s289_s14, 1 }
   0xe   : > { %s704_s20 = scalar_select %p553_p6, 1, 0 }
   0xf   : > { %p290_p9 = scmp.ge.s32.totalorder %s484_s12, 1  ;;  %p97_p10 = scmp.lt.s32.totalorder %s484_s12, 3 }
  0x10   : > { %p560_p11 = por %p84_p7, %p33_p0  ;;  %p564_p12 = por %p90_p8, %p39_p3 }
  0x11   : > { %p568_p13 = pnand %p290_p9, %p97_p10  ;;  %s110_s26 = sshll.u32 %s698_s1, 4  ;;  %s111_s26 = int_to_ptr.vmem [resolvable:$true] %s110_s26 }
  0x12   : > { %s705_s21 = scalar_select %p560_p11, 1, 0 }
  0x13   : > { %s706_s22 = scalar_select %p564_p12, 1, 0 }
  0x14   : > { %p316_p1 = pneg %p568_p13  ;;  %p329_p2 = scmp.lt.s32.totalorder %s484_s12, 2 }
  0x15   : > { %s121_s28 = sand.u32 1, %s480_s11   ;;  %s369_s3 = scalar_lea.vmem %s111_s26, 16 }
  0x16   : > { %p581_p7 = pnand %p316_p1, %p701_p4  ;;  %p588_p3 = pnand %p329_p2, %p547_p5 }
  0x17   : > { %s293_s30 = sshll.u32 %s121_s28, 4  ;;  %p370_p8 = scmp.ne.s32.totalorder %s111_s26, %s369_s3 }
  0x18   : > { %p371_p9 = pneg %p581_p7  ;;  %p377_p12 = scmp.lt.s32.totalorder %s111_s26, %s111_s26 }
  0x19   : > { %p378_p11 = scmp.lt.s32.totalorder %s369_s3, %s369_s3 }
  0x1a   : > { %p372_p10 = pnand %p371_p9, %p370_p8 }
  0x1b   : > { %p379_p1 = por %p378_p11, %p377_p12 }
  0x1c   : > { %p373_p0 = pneg %p372_p10 }
  0x1e   : > { %p380_p4 = pnand %p379_p1, %p373_p0 }
  0x20   : > { %383 = shalt.err (!%p380_p4)
}
  0x21   : > { %s486_s4 = smov [#allocation6]   ;;  %s306_s5 = sshll.u32 %s484_s12, 8 }
  0x22   : > { %319 = dma.vmem_to_smem (!%p581_p7), %s111_s26, 16, %s486_s4, [#allocation5]  }
  0x23   : > { %s125_s6 = scalar_lea.vmem [#allocation2], %s293_s30  ;;  %s600_s16 = scalar_lea.hbm %s697_s0, %s306_s5 }
  0x24   : > { %s132_s7 = sshll.u32 %s125_s6, 4  ;;  %s604_s17 = scalar_lea.sflag [#allocation3], %s121_s28  ;;  %s602_s7 = int_to_ptr.vmem [resolvable:$true] %s132_s7 }
  0x25   : > { %s384_s19 = scalar_lea.hbm %s600_s16, 256  ;;  %p386_p5 = pneg %p588_p3 }
  0x26   : > { %p385_p4 = scmp.ne.s32.totalorder %s600_s16, %s384_s19  ;;  %s389_s26 = scalar_lea.hbm %s697_s0, 512 }
  0x27   : > { %p390_p0 = scmp.lt.u32.totalorder %s600_s16, %s697_s0  ;;  %p391_p2 = scmp.lt.u32.totalorder %s389_s26, %s384_s19 }
  0x28   : > { %p387_p11 = pnand %p386_p5, %p385_p4  ;;  %p393_p8 = scmp.lt.u32.totalorder %s384_s19, %s600_s16 }
  0x29   : > { %p392_p7 = por %p391_p2, %p390_p0 }
  0x2a   : > { %p388_p12 = pneg %p387_p11 }
  0x2b   : > { %p394_p9 = por %p393_p8, %p392_p7 }
  0x2d   : > { %p395_p10 = pnand %p394_p9, %p388_p12 }
  0x2f   : > { %398 = shalt.err (!%p395_p10)
}
  0x30   : > { %s399_s28 = scalar_lea.vmem %s602_s7, 256  ;;  %s487_s3 = smov [#allocation2]  }
  0x31   : > { %p400_p1 = scmp.ne.s32.totalorder %s602_s7, %s399_s28  ;;  %s404_s4 = sshll.u32 %s487_s3, 4  ;;  %s405_s4 = int_to_ptr.vmem [resolvable:$false] %s404_s4 }
  0x32   : > { %s406_s5 = scalar_lea.vmem %s405_s4, 512  ;;  %p407_p6 = scmp.lt.s32.totalorder %s602_s7, %s405_s4 }
  0x33   : > { %p402_p4 = pnand %p400_p1, %p386_p5  ;;  %p408_p0 = scmp.lt.s32.totalorder %s406_s5, %s399_s28 }
  0x35   : > { %p403_p11 = pneg %p402_p4  ;;  %p409_p2 = por %p408_p0, %p407_p6 }
  0x37   : > { %p410_p7 = pnand %p409_p2, %p403_p11 }
  0x39   : > { %413 = shalt.err (!%p410_p7)
}
  0x3a   : > { %s488_s6 = smov 128   ;;  %s489_s8 = smov 8  }
  0x3b   : > { %323 = dma.hbm_to_vmem [thread:$0]  (!%p588_p3), %s600_s16, 256, %s602_s7, %s604_s17, %s488_s6, %s488_s6, %s489_s8  }
  0x3c   : > { %144 = sbr.rel (%p568_p13) target bundleno = 102 (0x66), region = 28  ;;  %s635_s14 = sand.u32 (!%p568_p13), 1, %s476_s10  }
  0x3d   : > { %s297_s19 = sshll.u32 (!%p568_p13), %s635_s14, 4  ;;  %s147_s24 = scalar_lea.sflag (!%p568_p13), [#allocation3], %s635_s14 }
  0x3e   : > { %s150_s25 = scalar_lea.vmem (!%p568_p13), [#allocation2], %s297_s19  ;;  %p710_p6 = scmp.ne.s32.totalorder (!%p568_p13), %s704_s20, 0 }
  0x43   : > { %459 = dma.done.wait (%p710_p6), %s147_s24, 256  }
  0x44   : > { %461 = vsyncadd (%p710_p6), %s147_s24, 4294967040  ;;  %p711_p5 = scmp.eq.s32.totalorder %s529_s13, 0 }
  0x46   : > { %463 = dma.done.wait (%p711_p5), [#allocation5], 16   ;;  %p712_p3 = pmov %p711_p5 }
  0x48   : > { %465 = vsyncadd (%p712_p3), [#allocation5], 4294967280 }
  0x49   : > { %159 = sfence }
  0x4a   : > { %s178_s23 = sld [smem:[#allocation6]]  ;;  %s300_s29 = sld [smem:[#allocation6 + $0x1]]  ;;  %v180_v0 = vld [vmem:[%s150_s25] sm:$0xff]  ;;  %v181_v1 = vld [vmem:[%s150_s25 + $0x8] sm:$0xff] }
  0x4b   : > { %s175_s7 = scalar_lea.vmem [#allocation7], %s297_s19  ;;  %s307_s17 = sshll.u32 %s529_s13, 8 }
  0x4c   : > { %s204_s16 = sshll.u32 %s175_s7, 4  ;;  %s653_s27 = scalar_lea.hbm %s699_s2, %s307_s17  ;;  %s648_s16 = int_to_ptr.vmem [resolvable:$true] %s204_s16 }
  0x4d   : > { %s191_s30 = scalar_lea.sflag [#allocation4], %s635_s14  ;;  %s414_s28 = scalar_lea.vmem %s648_s16, 256 }
  0x4e   : > { %p415_p13 = scmp.ne.s32.totalorder %s648_s16, %s414_s28  ;;  %p713_p12 = scmp.ne.s32.totalorder %s705_s21, 0 }
  0x4f   : > { %s490_s13 = smov [#allocation7]  }
  0x50   : > { %v182_v2 = vstv %s178_s23  ;;  %v185_v4 = vstv %s300_s29  ;;  %p416_p8 = pnand %p415_p13, %p713_p12  ;;  %s418_s3 = sshll.u32 %s490_s13, 4  ;;  %s419_s3 = int_to_ptr.vmem [resolvable:$false] %s418_s3 }
  0x51   : > { %v183_v3 = vmul.f32 %v182_v2, %v180_v0  ;;  %v184_v5 = vmul.f32 %v182_v2, %v181_v1  ;;  %s420_s4 = scalar_lea.vmem %s419_s3, 512  ;;  %p421_p10 = scmp.lt.s32.totalorder %s648_s16, %s419_s3 }
  0x52   : > { %p417_p9 = pneg %p416_p8  ;;  %p422_p1 = scmp.lt.s32.totalorder %s420_s4, %s414_s28 }
  0x53   : > { %v186_v6 = vadd.f32 %v185_v4, %v183_v3  ;;  %v187_v7 = vadd.f32 %v185_v4, %v184_v5 }
  0x54   : > { %p423_p4 = por %p422_p1, %p421_p10 }
  0x55   : > { %188 = vst [vmem:[%s175_s7] sm:$0xff] %v186_v6  ;;  %189 = vst [vmem:[%s175_s7 + $0x8] sm:$0xff] %v187_v7 }
  0x56   : > { %p424_p11 = pnand %p423_p4, %p417_p9 }
  0x58   : > { %427 = shalt.err (!%p424_p11)
}
  0x59   : > { %s428_s5 = scalar_lea.hbm %s653_s27, 256  ;;  %s432_s19 = scalar_lea.hbm %s699_s2, 512 }
  0x5a   : > { %p429_p0 = scmp.ne.s32.totalorder %s653_s27, %s428_s5  ;;  %p433_p6 = scmp.lt.u32.totalorder %s653_s27, %s699_s2 }
  0x5b   : > { %p434_p5 = scmp.lt.u32.totalorder %s432_s19, %s428_s5  ;;  %p436_p13 = scmp.lt.u32.totalorder %s428_s5, %s653_s27 }
  0x5c   : > { %p430_p2 = pnand %p429_p0, %p713_p12 }
  0x5d   : > { %p435_p3 = por %p434_p5, %p433_p6 }
  0x5e   : > { %p431_p7 = pneg %p430_p2 }
  0x5f   : > { %p437_p8 = por %p436_p13, %p435_p3 }
  0x61   : > { %p438_p9 = pnand %p437_p8, %p431_p7 }
  0x63   : > { %441 = shalt.err (!%p438_p9)
}
  0x64   : > { %s491_s23 = smov 128   ;;  %s492_s29 = smov 8  }
  0x65   : > { %314 = dma.vmem_to_hbm [thread:$0]  (%p713_p12), %s648_s16, 256, %s653_s27, %s191_s30, %s491_s23, %s491_s23, %s492_s29  }
  0x66 PF: > { %s219_s7 = sand.u32 1, %s472_s9   ;;  %p714_p10 = scmp.ne.s32.totalorder %s706_s22, 0 }
  0x67   : > { %p715_p1 = scmp.ge.s32.totalorder %s484_s12, 2  ;;  %s220_s17 = scalar_lea.sflag [#allocation4], %s219_s7 }
  0x69   : > { %p325_p4 = pnand %p715_p1, %p714_p10 }
  0x6b   : > { %467 = dma.done.wait (!%p325_p4), %s220_s17, 256  }
  0x6c   : > { %469 = vsyncadd (!%p325_p4), %s220_s17, 4294967040  ;;  %p16_p11 = scmp.ge.s32.totalorder %s533_s15, 4   ;;  %s716_s9 = smov %s476_s10 }
  0x6d   : > { %s717_s10 = smov %s480_s11  ;;  %s718_s11 = smov %s545_s18 }
  0x6e   : > { %s719_s12 = smov %s533_s15  ;;  %18 = sbr.rel (!%p16_p11) target bundleno = 6 (0x6), region = 78 }
  0x75   :  { %225 = vsyncpa [#allocation3], 1 }
  0x76   :  { %227 = vsyncpa [#allocation3 + $0x1], 1 }
  0x77   :  { %228 = vsyncpa [#allocation4], 1 }
  0x78   :  { %230 = vsyncpa [#allocation4 + $0x1], 1 }
  0x79   :  { %231 = vsyncpa [#allocation5], 1 }
  0x7a   :  { %233 = vsyncpa [#allocation5 + $0x1], 1 }

</bundles_post_ra>
